<compile_context>
chip_gen: v7x
topology: tpu7x:2x2x1
jax: 0.10.0
libtpu: 0.0.40
codegen_flags: <defaults>
</compile_context>

<pallas_src>
import functools
import math

import jax
import jax.numpy as jnp
from jax import lax
from jax.experimental import pallas as pl
from jax.experimental.pallas import tpu as pltpu

NEG_INF_MASK = -1000000.0   # same fill value as the reference mask_softmax


# ---------------------------------------------------------------------------
# helpers
# ---------------------------------------------------------------------------

def _round_up(x, m):
    return ((x + m - 1) // m) * m


def _min_tile(itemsize):
    # dtype-aware sublane minimum: f32 -> 8, bf16 -> 16, int8/fp8 -> 32
    return {4: 8, 2: 16, 1: 32}.get(itemsize, 8)


def _choose_tile(n, target, min_tile):
    """Tile size for an axis of length n.

    n <= target : one tile == n (full-axis block, always a legal block shape).
    n  > target : split into ceil(n/target) roughly equal tiles rounded up to
                  the dtype sublane minimum; the wrapper pads n to a multiple.
    """
    if n <= target:
        return n
    n_tiles = pl.cdiv(n, target)
    return _round_up(pl.cdiv(n, n_tiles), min_tile)


def _vmem_capacity_bytes():
    try:
        info = pltpu.get_tpu_info()
        for name in ("vmem_capacity_bytes", "vmem_bytes", "vmem_capacity"):
            val = getattr(info, name, None)
            if val:
                return int(val)
    except Exception:
        pass
    return 64 * 1024 * 1024      # conservative fallback (v7x per-TC VMEM)


def _flash_vmem_bytes(tq, tk, D, Dv, item):
    tiles = 2 * (tq * D + tk * D + tk * Dv + tq * Dv) * item   # double-buffered q/k/v/out
    tiles += 2 * tq * 4                                        # valid_lens block
    scratch = (tq * Dv + 2 * tq) * 4                           # f32 acc / m / l
    temps = 3 * tq * tk * 4                                    # f32 score/prob temporaries
    return tiles + scratch + temps


def _weights_vmem_bytes(tq, nk, D, Dv, item):
    tiles = 2 * (tq * D + nk * D + nk * Dv + tq * Dv + tq * nk) * item
    tiles += 2 * tq * 4
    temps = 3 * tq * nk * 4
    return tiles + temps


def _normalize_valid_lens(valid_lens, B, Nq, Nk):
    """mask_softmax's 1-D / 2-D semantics -> (B, Nq, 1) int32, clipped to Nk."""
    vl = jnp.asarray(valid_lens, jnp.int32)
    if vl.ndim == 1:                       # repeat_interleave over queries
        vl = jnp.broadcast_to(vl[:, None], (B, Nq))
    else:
        vl = vl.reshape(B, Nq)
    return jnp.minimum(vl, Nk).reshape(B, Nq, 1)


# ---------------------------------------------------------------------------
# kernel building blocks
# ---------------------------------------------------------------------------

def _qk(q2, k2, mm_dtype):
    if mm_dtype is not None:
        q2 = q2.astype(mm_dtype)
        k2 = k2.astype(mm_dtype)
    return lax.dot_general(q2, k2, (((1,), (1,)), ((), ())),
                           preferred_element_type=jnp.float32)


def _pv(p, v2, mm_dtype):
    tgt = v2.dtype if mm_dtype is None else mm_dtype
    return lax.dot_general(p.astype(tgt), v2.astype(tgt), (((1,), (0,)), ((), ())),
                           preferred_element_type=jnp.float32)


def _flash_step(ki, active, s_fn, v_ref, m_sc, l_sc, acc_sc, mm_dtype):
    """Online-softmax update; the first kv step (always active) skips the rescale."""

    @pl.when(ki == 0)
    def _():
        s = s_fn()
        m_cur = jnp.max(s, axis=-1, keepdims=True)
        p = jnp.exp(s - m_cur)
        m_sc[...] = m_cur
        l_sc[...] = jnp.sum(p, axis=-1, keepdims=True)
        acc_sc[...] = _pv(p, v_ref[0], mm_dtype)

    @pl.when(jnp.logical_and(ki > 0, active))
    def _():
        s = s_fn()
        m_prev = m_sc[...]
        m_new = jnp.maximum(m_prev, jnp.max(s, axis=-1, keepdims=True))
        alpha = jnp.exp(m_prev - m_new)
        p = jnp.exp(s - m_new)
        l_sc[...] = alpha * l_sc[...] + jnp.sum(p, axis=-1, keepdims=True)
        acc_sc[...] = alpha * acc_sc[...] + _pv(p, v_ref[0], mm_dtype)
        m_sc[...] = m_new


def _flash_nomask_kernel(q_ref, k_ref, v_ref, o_ref, m_sc, l_sc, acc_sc,
                         *, scale, mm_dtype):
    ki = pl.program_id(2)

    def s_fn():
        q2 = q_ref[0] * jnp.asarray(scale, q_ref.dtype)   # fold 1/sqrt(d) into q
        return _qk(q2, k_ref[0], mm_dtype)

    _flash_step(ki, True, s_fn, v_ref, m_sc, l_sc, acc_sc, mm_dtype)

    @pl.when(ki == pl.num_programs(2) - 1)
    def _():
        inv_l = pl.reciprocal(l_sc[...], approx=False)
        o_ref[0] = (acc_sc[...] * inv_l).astype(o_ref.dtype)


def _flash_masked_kernel(mv_ref, q_ref, k_ref, v_ref, vl_ref, o_ref,
                         m_sc, l_sc, acc_sc, *, scale, block_k, mm_dtype):
    b = pl.program_id(0)
    qi = pl.program_id(1)
    ki = pl.program_id(2)
    max_vl = mv_ref[b, qi]                      # SMEM scalar-prefetch value
    active = (ki * block_k) < max_vl            # skip fully masked kv tiles

    def s_fn():
        q2 = q_ref[0] * jnp.asarray(scale, q_ref.dtype)
        s = _qk(q2, k_ref[0], mm_dtype)
        col = lax.broadcasted_iota(jnp.int32, s.shape, 1)   # constant per tile
        limit = vl_ref[0] - ki * block_k                    # (TQ, 1) int subtract
        return jnp.where(col < limit, s, jnp.float32(NEG_INF_MASK))

    _flash_step(ki, active, s_fn, v_ref, m_sc, l_sc, acc_sc, mm_dtype)

    @pl.when(ki == pl.num_programs(2) - 1)
    def _():
        inv_l = pl.reciprocal(l_sc[...], approx=False)
        o_ref[0] = (acc_sc[...] * inv_l).astype(o_ref.dtype)


def _weights_nomask_kernel(q_ref, k_ref, v_ref, o_ref, w_ref, *, scale, mm_dtype):
    q2 = q_ref[0] * jnp.asarray(scale, q_ref.dtype)
    s = _qk(q2, k_ref[0], mm_dtype)
    m = jnp.max(s, axis=-1, keepdims=True)
    e = jnp.exp(s - m)
    w = e * pl.reciprocal(jnp.sum(e, axis=-1, keepdims=True), approx=False)
    w_ref[0] = w.astype(w_ref.dtype)
    o_ref[0] = _pv(w, v_ref[0], mm_dtype).astype(o_ref.dtype)


def _weights_masked_kernel(q_ref, k_ref, v_ref, vl_ref, o_ref, w_ref,
                           *, scale, mm_dtype):
    q2 = q_ref[0] * jnp.asarray(scale, q_ref.dtype)
    s = _qk(q2, k_ref[0], mm_dtype)
    col = lax.broadcasted_iota(jnp.int32, s.shape, 1)
    s = jnp.where(col < vl_ref[0], s, jnp.float32(NEG_INF_MASK))
    m = jnp.max(s, axis=-1, keepdims=True)
    e = jnp.exp(s - m)
    w = e * pl.reciprocal(jnp.sum(e, axis=-1, keepdims=True), approx=False)
    w_ref[0] = w.astype(w_ref.dtype)
    o_ref[0] = _pv(w, v_ref[0], mm_dtype).astype(o_ref.dtype)


# ---------------------------------------------------------------------------
# wrapper
# ---------------------------------------------------------------------------

def dot_product_attention(q, k, v, valid_lens=None, *,
                          return_attn_weights=False,
                          block_q=None, block_k=None,
                          matmul_dtype=None):
    """Pallas TPU DotProductAttention.forward (eval mode).

    Returns `output`, or `(output, attn_weights)` if return_attn_weights=True.
    matmul_dtype: optional opt-in (e.g. jnp.bfloat16) to run both MXU matmuls
    in lower precision with f32 accumulation (faster on v6e/v7x; looser tol).
    """
    q = jnp.asarray(q)
    k = jnp.asarray(k)
    v = jnp.asarray(v)
    dtype = jnp.result_type(q.dtype, k.dtype, v.dtype)
    q, k, v = q.astype(dtype), k.astype(dtype), v.astype(dtype)

    B, Nq, D = q.shape
    _, Nk, Dv = v.shape
    scale = 1.0 / math.sqrt(D)
    item = jnp.dtype(dtype).itemsize
    min_t = _min_tile(item)

    vmem_cap = _vmem_capacity_bytes()
    budget = int(0.85 * vmem_cap)              # headroom for compiler scratch/sems
    big_vmem = vmem_cap >= 96 * 1024 * 1024    # v5e/v6e (128 MiB) vs v7x (64 MiB)
    if block_q is None:
        block_q = 512 if big_vmem else 256
    if block_k is None:
        block_k = 1024 if big_vmem else 512

    # --------------------- weights path (opt-in) ----------------------------
    if return_attn_weights:
        tq = _choose_tile(Nq, block_q, min_t)
        while _weights_vmem_bytes(tq, Nk, D, Dv, item) > budget and tq > min_t:
            tq = max(min_t, _round_up(tq // 2, min_t))
        footprint = _weights_vmem_bytes(tq, Nk, D, Dv, item)
        if footprint > budget:
            raise ValueError(
                "return_attn_weights path needs ~%.1f MiB VMEM (> %.1f MiB budget); "
                "use the flash path (return_attn_weights=False) or a smaller Nk."
                % (footprint / 2**20, budget / 2**20))

        n_q = pl.cdiv(Nq, tq)
        Nq_pad = n_q * tq
        q_p = q if Nq_pad == Nq else jnp.pad(q, ((0, 0), (0, Nq_pad - Nq), (0, 0)))

        vmem_limit = None
        if footprint > 32 * 1024 * 1024:
            vmem_limit = min(int(1.25 * footprint), budget)
        cp = pltpu.CompilerParams(dimension_semantics=("parallel", "parallel"),
                                  vmem_limit_bytes=vmem_limit)

        out_shapes = (jax.ShapeDtypeStruct((B, Nq_pad, Dv), dtype),
                      jax.ShapeDtypeStruct((B, Nq_pad, Nk), dtype))
        out_specs = [pl.BlockSpec((1, tq, Dv), lambda b, qi: (b, qi, 0)),
                     pl.BlockSpec((1, tq, Nk), lambda b, qi: (b, qi, 0))]
        q_spec = pl.BlockSpec((1, tq, D), lambda b, qi: (b, qi, 0))
        k_spec = pl.BlockSpec((1, Nk, D), lambda b, qi: (b, 0, 0))
        v_spec = pl.BlockSpec((1, Nk, Dv), lambda b, qi: (b, 0, 0))

        if valid_lens is None:
            out, w = pl.pallas_call(
                functools.partial(_weights_nomask_kernel, scale=scale,
                                  mm_dtype=matmul_dtype),
                out_shape=out_shapes,
                grid_spec=pltpu.PrefetchScalarGridSpec(
                    num_scalar_prefetch=0, grid=(B, n_q),
                    in_specs=[q_spec, k_spec, v_spec],
                    out_specs=out_specs),
                compiler_params=cp,
            )(q_p, k, v)
        else:
            vl = _normalize_valid_lens(valid_lens, B, Nq, Nk)
            if Nq_pad != Nq:
                vl = jnp.pad(vl, ((0, 0), (0, Nq_pad - Nq), (0, 0)),
                             constant_values=1)
            out, w = pl.pallas_call(
                functools.partial(_weights_masked_kernel, scale=scale,
                                  mm_dtype=matmul_dtype),
                out_shape=out_shapes,
                grid_spec=pltpu.PrefetchScalarGridSpec(
                    num_scalar_prefetch=0, grid=(B, n_q),
                    in_specs=[q_spec, k_spec, v_spec,
                              pl.BlockSpec((1, tq, 1), lambda b, qi: (b, qi, 0))],
                    out_specs=out_specs),
                compiler_params=cp,
            )(q_p, k, v, vl)
        if Nq_pad != Nq:
            out = out[:, :Nq]
            w = w[:, :Nq]
        return out, w

    # --------------------- flash path (default) -----------------------------
    tq = _choose_tile(Nq, block_q, min_t)
    tk = _choose_tile(Nk, block_k, min_t)

    # v7x: both TensorCores should get work -> keep parallel extent >= 2.
    if B * pl.cdiv(Nq, tq) < 2:
        half = _round_up(pl.cdiv(Nq, 2), min_t)
        if 0 < half < Nq:
            tq = half

    # Shrink tiles until the footprint fits the per-core VMEM budget.
    while _flash_vmem_bytes(tq, tk, D, Dv, item) > budget and max(tq, tk) > min_t:
        if tk >= tq:
            tk = max(min_t, _round_up(tk // 2, min_t))
        else:
            tq = max(min_t, _round_up(tq // 2, min_t))

    n_q = pl.cdiv(Nq, tq)
    n_k = pl.cdiv(Nk, tk)
    Nq_pad, Nk_pad = n_q * tq, n_k * tk

    q_p = q if Nq_pad == Nq else jnp.pad(q, ((0, 0), (0, Nq_pad - Nq), (0, 0)))
    k_p = k if Nk_pad == Nk else jnp.pad(k, ((0, 0), (0, Nk_pad - Nk), (0, 0)))
    v_p = v if Nk_pad == Nk else jnp.pad(v, ((0, 0), (0, Nk_pad - Nk), (0, 0)))

    footprint = _flash_vmem_bytes(tq, tk, D, Dv, item)
    vmem_limit = None
    if footprint > 32 * 1024 * 1024:
        vmem_limit = min(int(1.25 * footprint), budget)
    cp = pltpu.CompilerParams(
        dimension_semantics=("parallel", "parallel", "arbitrary"),
        vmem_limit_bytes=vmem_limit)

    scratch = [pltpu.VMEM((tq, 1), jnp.float32),    # running max m
               pltpu.VMEM((tq, 1), jnp.float32),    # running denom l
               pltpu.VMEM((tq, Dv), jnp.float32)]   # output accumulator

    # Padded key columns must be masked, so padding Nk forces the masked path.
    use_mask = (valid_lens is not None) or (Nk_pad != Nk)

    if not use_mask:
        out = pl.pallas_call(
            functools.partial(_flash_nomask_kernel, scale=scale,
                              mm_dtype=matmul_dtype),
            out_shape=jax.ShapeDtypeStruct((B, Nq_pad, Dv), dtype),
            grid_spec=pltpu.PrefetchScalarGridSpec(
                num_scalar_prefetch=0, grid=(B, n_q, n_k),
                in_specs=[pl.BlockSpec((1, tq, D), lambda b, qi, ki: (b, qi, 0)),
                          pl.BlockSpec((1, tk, D), lambda b, qi, ki: (b, ki, 0)),
                          pl.BlockSpec((1, tk, Dv), lambda b, qi, ki: (b, ki, 0))],
                out_specs=pl.BlockSpec((1, tq, Dv), lambda b, qi, ki: (b, qi, 0)),
                scratch_shapes=scratch),
            compiler_params=cp,
        )(q_p, k_p, v_p)
    else:
        if valid_lens is None:
            vl = jnp.full((B, Nq, 1), Nk, dtype=jnp.int32)
        else:
            vl = _normalize_valid_lens(valid_lens, B, Nq, Nk)
        if Nq_pad != Nq:
            vl = jnp.pad(vl, ((0, 0), (0, Nq_pad - Nq), (0, 0)), constant_values=1)

        # Per-(batch, q-tile) max valid length; used to skip fully masked kv
        # tiles and to clamp the K/V index_maps so no DMA is issued for them.
        vl_tiles = vl.reshape(B, n_q, tq)
        tile_max = jnp.max(vl_tiles, axis=-1)
        # valid_len == 0 rows follow the reference ("-1e6 everywhere" -> uniform
        # over all keys): force full processing for tiles containing them.
        tile_max = jnp.where(jnp.min(vl_tiles, axis=-1) == 0, Nk_pad, tile_max)
        tile_max = tile_max.astype(jnp.int32)

        def kv_map(b, qi, ki, mv):
            last = jnp.maximum((mv[b, qi] + (tk - 1)) // tk, 1) - 1
            return (b, jnp.minimum(ki, last), 0)

        out = pl.pallas_call(
            functools.partial(_flash_masked_kernel, scale=scale, block_k=tk,
                              mm_dtype=matmul_dtype),
            out_shape=jax.ShapeDtypeStruct((B, Nq_pad, Dv), dtype),
            grid_spec=pltpu.PrefetchScalarGridSpec(
                num_scalar_prefetch=1, grid=(B, n_q, n_k),
                in_specs=[pl.BlockSpec((1, tq, D), lambda b, qi, ki, mv: (b, qi, 0)),
                          pl.BlockSpec((1, tk, D), kv_map),
                          pl.BlockSpec((1, tk, Dv), kv_map),
                          pl.BlockSpec((1, tq, 1), lambda b, qi, ki, mv: (b, qi, 0))],
                out_specs=pl.BlockSpec((1, tq, Dv), lambda b, qi, ki, mv: (b, qi, 0)),
                scratch_shapes=scratch),
            compiler_params=cp,
        )(tile_max, q_p, k_p, v_p, vl)

    if Nq_pad != Nq:
        out = out[:, :Nq]
    return out


# ---------------------------------------------------------------------------
# reference + tests
# ---------------------------------------------------------------------------

def _reference(q, k, v, valid_lens=None):
    """Pure-JAX reference matching the PyTorch module."""
    B, Nq, D = q.shape
    Nk = k.shape[1]
    scores = jnp.einsum("bqd,bkd->bqk", q, k) / math.sqrt(D)
    if valid_lens is not None:
        vl = jnp.asarray(valid_lens, jnp.int32)
        if vl.ndim == 1:
            vl = jnp.broadcast_to(vl[:, None], (B, Nq))
        mask = jnp.arange(Nk)[None, None, :] < vl[:, :, None]
        scores = jnp.where(mask, scores, NEG_INF_MASK)
    w = jax.nn.softmax(scores, axis=-1)
    return jnp.einsum("bqk,bkd->bqd", w, v), w


if __name__ == "__main__":
    root = jax.random.PRNGKey(0)
    kq, kk, kv_, krest = jax.random.split(root, 4)

    # --- small module-like shapes: output AND attention weights -------------
    B, Nq, Nk, D, Dv = 2, 8, 8, 32, 32
    q = jax.random.normal(kq, (B, Nq, D), dtype=jnp.float32)
    k = jax.random.normal(kk, (B, Nk, D), dtype=jnp.float32)
    v = jax.random.normal(kv_, (B, Nk, Dv), dtype=jnp.float32)
    valid_lens = jnp.array([3, 6], dtype=jnp.int32)     # per-batch (1-D) lens

    out, attn = dot_product_attention(q, k, v, valid_lens,
                                      return_attn_weights=True)
    out = jax.block_until_ready(out)
    attn = jax.block_until_ready(attn)
    ref_out, ref_attn = _reference(q, k, v, valid_lens)
    assert jnp.allclose(out, ref_out, atol=1e-5, rtol=1e-5)
    assert jnp.allclose(attn, ref_attn, atol=1e-5, rtol=1e-5)

    # flash (output-only) path: masked and unmasked (mask-free kernel variant)
    out_f = jax.block_until_ready(dot_product_attention(q, k, v, valid_lens))
    assert jnp.allclose(out_f, ref_out, atol=1e-5, rtol=1e-5)
    out_u = jax.block_until_ready(dot_product_attention(q, k, v, None))
    ref_u, _ = _reference(q, k, v, None)
    assert jnp.allclose(out_u, ref_u, atol=1e-5, rtol=1e-5)

    # --- larger case: multiple KV tiles -> online softmax + tile skipping ---
    B2, S2, D2 = 2, 128, 64
    kq2, kk2, kv2 = jax.random.split(krest, 3)
    q2 = jax.random.normal(kq2, (B2, S2, D2), dtype=jnp.float32)
    k2 = jax.random.normal(kk2, (B2, S2, D2), dtype=jnp.float32)
    v2 = jax.random.normal(kv2, (B2, S2, D2), dtype=jnp.float32)
    vl2 = jnp.broadcast_to(jnp.arange(1, S2 + 1, dtype=jnp.int32)[None, :],
                           (B2, S2))
    out2 = jax.block_until_ready(
        dot_product_attention(q2, k2, v2, vl2, block_q=64, block_k=64))
    ref2, _ = _reference(q2, k2, v2, vl2)
    assert jnp.allclose(out2, ref2, atol=1e-5, rtol=1e-5)

    # --- awkward (non-divisible) Nq / Nk: exercises padding path ------------
    B3, Nq3, Nk3, D3 = 2, 24, 40, 32
    kq3, kk3, kv3 = jax.random.split(jax.random.PRNGKey(7), 3)
    q3 = jax.random.normal(kq3, (B3, Nq3, D3), dtype=jnp.float32)
    k3 = jax.random.normal(kk3, (B3, Nk3, D3), dtype=jnp.float32)
    v3 = jax.random.normal(kv3, (B3, Nk3, D3), dtype=jnp.float32)
    vl3 = jnp.stack([jnp.linspace(1, Nk3, Nq3).astype(jnp.int32)] * B3)
    out3m = jax.block_until_ready(
        dot_product_attention(q3, k3, v3, vl3, block_q=16, block_k=16))
    ref3m, _ = _reference(q3, k3, v3, vl3)
    assert jnp.allclose(out3m, ref3m, atol=1e-5, rtol=1e-5)
    out3u = jax.block_until_ready(
        dot_product_attention(q3, k3, v3, None, block_q=16, block_k=16))
    ref3u, _ = _reference(q3, k3, v3, None)
    assert jnp.allclose(out3u, ref3u, atol=1e-5, rtol=1e-5)

    print("KERNEL_OK")
</pallas_src>

<mosaic_0001>
module attributes {stable_mosaic.version = 11 : i64} {
  func.func @_weights_masked_kernel(%arg0: i32, %arg1: i32, %arg2: memref<1x8x32xf32, #tpu.memory_space<vmem>>, %arg3: memref<1x8x32xf32, #tpu.memory_space<vmem>>, %arg4: memref<1x8x32xf32, #tpu.memory_space<vmem>>, %arg5: memref<1x8x1xi32, #tpu.memory_space<vmem>>, %arg6: memref<1x8x32xf32, #tpu.memory_space<vmem>>, %arg7: memref<1x8x8xf32, #tpu.memory_space<vmem>>) attributes {dimension_semantics = [#tpu.dimension_semantics<parallel>, #tpu.dimension_semantics<parallel>], iteration_bounds = array<i64: 2, 1>, scalar_prefetch = 0 : i64, scratch_operands = 0 : i64, tpu.core_type = #tpu.core_type<tc>, window_params = [{transform_indices = @transform_0, window_bounds = array<i64: 1, 8, 32>}, {transform_indices = @transform_1, window_bounds = array<i64: 1, 8, 32>}, {transform_indices = @transform_2, window_bounds = array<i64: 1, 8, 32>}, {transform_indices = @transform_3, window_bounds = array<i64: 1, 8, 1>}, {transform_indices = @transform_4, window_bounds = array<i64: 1, 8, 32>}, {transform_indices = @transform_5, window_bounds = array<i64: 1, 8, 8>}]} {
    %c0 = arith.constant 0 : index
    %c0_0 = arith.constant 0 : index
    %c0_1 = arith.constant 0 : index
    %0 = vector.load %arg2[%c0, %c0_0, %c0_1] : memref<1x8x32xf32, #tpu.memory_space<vmem>>, vector<1x8x32xf32>
    %1 = vector.shape_cast %0 : vector<1x8x32xf32> to vector<8x32xf32>
    %cst = arith.constant 0.176776692 : f32
    %2 = vector.broadcast %cst : f32 to vector<8x32xf32>
    %3 = arith.mulf %1, %2 : vector<8x32xf32>
    %c0_2 = arith.constant 0 : index
    %c0_3 = arith.constant 0 : index
    %c0_4 = arith.constant 0 : index
    %4 = vector.load %arg3[%c0_2, %c0_3, %c0_4] : memref<1x8x32xf32, #tpu.memory_space<vmem>>, vector<1x8x32xf32>
    %5 = vector.shape_cast %4 : vector<1x8x32xf32> to vector<8x32xf32>
    %cst_5 = arith.constant dense<0.000000e+00> : vector<8x8xf32>
    %6 = tpu.matmul %3, %5, %cst_5 {dimension_numbers = #tpu.dot_dimension_numbers<[1], [1], [0], [0], [0, 0, 1, 0], [], []>} : vector<8x32xf32>, vector<8x32xf32>, vector<8x8xf32> -> vector<8x8xf32>
    %7 = tpu.iota {dimensions = array<i32: 1>} : vector<8x8xi32>
    %c0_6 = arith.constant 0 : index
    %c0_7 = arith.constant 0 : index
    %c0_8 = arith.constant 0 : index
    %8 = vector.load %arg5[%c0_6, %c0_7, %c0_8] : memref<1x8x1xi32, #tpu.memory_space<vmem>>, vector<1x8x1xi32>
    %9 = vector.shape_cast %8 : vector<1x8x1xi32> to vector<8x1xi32>
    %10 = vector.broadcast %9 : vector<8x1xi32> to vector<8x8xi32>
    %11 = arith.cmpi slt, %7, %10 : vector<8x8xi32>
    %cst_9 = arith.constant -1.000000e+06 : f32
    %12 = vector.broadcast %cst_9 : f32 to vector<8x8xf32>
    %13 = arith.select %11, %6, %12 : vector<8x8xi1>, vector<8x8xf32>
    %cst_10 = arith.constant dense<0xFF800000> : vector<8xf32>
    %14 = vector.multi_reduction <maximumf>, %13, %cst_10 [1] : vector<8x8xf32> to vector<8xf32>
    %15 = vector.shape_cast %14 : vector<8xf32> to vector<8x1xf32>
    %16 = vector.broadcast %15 : vector<8x1xf32> to vector<8x8xf32>
    %17 = arith.subf %13, %16 : vector<8x8xf32>
    %18 = math.exp %17 : vector<8x8xf32>
    %cst_11 = arith.constant dense<0.000000e+00> : vector<8xf32>
    %19 = vector.multi_reduction <add>, %18, %cst_11 [1] : vector<8x8xf32> to vector<8xf32>
    %20 = vector.shape_cast %19 : vector<8xf32> to vector<8x1xf32>
    %21 = tpu.reciprocal %20 : vector<8x1xf32> -> vector<8x1xf32>
    %22 = vector.broadcast %21 : vector<8x1xf32> to vector<8x8xf32>
    %23 = arith.mulf %18, %22 : vector<8x8xf32>
    %c0_12 = arith.constant 0 : index
    %c0_13 = arith.constant 0 : index
    %c0_14 = arith.constant 0 : index
    %24 = vector.load %arg7[%c0_12, %c0_13, %c0_14] : memref<1x8x8xf32, #tpu.memory_space<vmem>>, vector<1x8x8xf32>
    %25 = vector.shape_cast %24 : vector<1x8x8xf32> to vector<8x8xf32>
    %26 = vector.shape_cast %23 : vector<8x8xf32> to vector<1x8x8xf32>
    tpu.vector_store %arg7[%c0_12, %c0_13, %c0_14], %26 {strides = array<i32>} : memref<1x8x8xf32, #tpu.memory_space<vmem>>, vector<1x8x8xf32>,
    %c0_15 = arith.constant 0 : index
    %c0_16 = arith.constant 0 : index
    %c0_17 = arith.constant 0 : index
    %27 = vector.load %arg4[%c0_15, %c0_16, %c0_17] : memref<1x8x32xf32, #tpu.memory_space<vmem>>, vector<1x8x32xf32>
    %28 = vector.shape_cast %27 : vector<1x8x32xf32> to vector<8x32xf32>
    %cst_18 = arith.constant dense<0.000000e+00> : vector<8x32xf32>
    %29 = tpu.matmul %23, %28, %cst_18 {dimension_numbers = #tpu.dot_dimension_numbers<[1], [0], [0], [1], [0, 0, 1, 1], [], []>} : vector<8x8xf32>, vector<8x32xf32>, vector<8x32xf32> -> vector<8x32xf32>
    %c0_19 = arith.constant 0 : index
    %c0_20 = arith.constant 0 : index
    %c0_21 = arith.constant 0 : index
    %30 = vector.load %arg6[%c0_19, %c0_20, %c0_21] : memref<1x8x32xf32, #tpu.memory_space<vmem>>, vector<1x8x32xf32>
    %31 = vector.shape_cast %30 : vector<1x8x32xf32> to vector<8x32xf32>
    %32 = vector.shape_cast %29 : vector<8x32xf32> to vector<1x8x32xf32>
    tpu.vector_store %arg6[%c0_19, %c0_20, %c0_21], %32 {strides = array<i32>} : memref<1x8x32xf32, #tpu.memory_space<vmem>>, vector<1x8x32xf32>,
    return
  }
  func.func @transform_0(%arg0: i32, %arg1: i32) -> (i32, i32, i32) {
    %c0_i32 = arith.constant 0 : i32
    %c0_i32_0 = arith.constant 0 : i32
    return %arg0, %arg1, %c0_i32 : i32, i32, i32
  }
  func.func @transform_1(%arg0: i32, %arg1: i32) -> (i32, i32, i32) {
    %c0_i32 = arith.constant 0 : i32
    %c0_i32_0 = arith.constant 0 : i32
    %c0_i32_1 = arith.constant 0 : i32
    return %arg0, %c0_i32, %c0_i32_0 : i32, i32, i32
  }
  func.func @transform_2(%arg0: i32, %arg1: i32) -> (i32, i32, i32) {
    %c0_i32 = arith.constant 0 : i32
    %c0_i32_0 = arith.constant 0 : i32
    %c0_i32_1 = arith.constant 0 : i32
    return %arg0, %c0_i32, %c0_i32_0 : i32, i32, i32
  }
  func.func @transform_3(%arg0: i32, %arg1: i32) -> (i32, i32, i32) {
    %c0_i32 = arith.constant 0 : i32
    %c0_i32_0 = arith.constant 0 : i32
    return %arg0, %arg1, %c0_i32 : i32, i32, i32
  }
  func.func @transform_4(%arg0: i32, %arg1: i32) -> (i32, i32, i32) {
    %c0_i32 = arith.constant 0 : i32
    %c0_i32_0 = arith.constant 0 : i32
    return %arg0, %arg1, %c0_i32 : i32, i32, i32
  }
  func.func @transform_5(%arg0: i32, %arg1: i32) -> (i32, i32, i32) {
    %c0_i32 = arith.constant 0 : i32
    %c0_i32_0 = arith.constant 0 : i32
    return %arg0, %arg1, %c0_i32 : i32, i32, i32
  }
}

</mosaic_0001>

<bundles_post_ra>
// kernel: tpu_custom_call.1
= control target key start
LH: loop header
LB: loop body
LE: loop exit
PB: predicated region body
PF: predicated region fallthrough
CT: control target
= control target key end

     0   :  { %11 = vsyncpa [#allocation3], 0  ;;  %s1340_s0 = inlined_call_operand.vmem [shape: f32[2,8,32], index: 0, kind: input, shape index: {}]   ;;  %s1341_s1 = inlined_call_operand.hbm [shape: f32[2,8,32], index: 1, kind: input, shape index: {}]   ;;  %s1342_s2 = inlined_call_operand.hbm [shape: f32[2,8,32], index: 2, kind: input, shape index: {}]   ;;  %s1343_s3 = inlined_call_operand.vmem [shape: s32[2,8,1], index: 3, kind: input, shape index: {}]   ;;  %s1344_s4 = inlined_call_operand.hbm [shape: f32[2,8,32], index: 4, kind: output, shape index: {0}]   ;;  %s1345_s5 = inlined_call_operand.hbm [shape: f32[2,8,8], index: 5, kind: output, shape index: {1}]  }
   0x1   :  { %13 = vsyncpa [#allocation3 + $0x1], 0 }
   0x2   :  { %14 = vsyncpa [#allocation6], 0 }
   0x3   :  { %16 = vsyncpa [#allocation6 + $0x1], 0 }
   0x4   :  { %17 = vsyncpa [#allocation4], 0 }
   0x5   :  { %19 = vsyncpa [#allocation4 + $0x1], 0 }
   0x6   :  { %20 = vsyncpa [#allocation9], 0 }
   0x7   :  { %22 = vsyncpa [#allocation9 + $0x1], 0  ;;  %s1070_s18 = smov 0   ;;  %s1072_s19 = smov 0  }
   0x8   :  { %s1074_s20 = smov 0   ;;  %s1076_s21 = smov 0  }
   0x9   :  { %s1078_s22 = smov 0   ;;  %s1080_s23 = smov 0  }
   0xa LB: > { %s735_s24 = sadd.s32 4294967295, %s1031_s23   ;;  %s736_s25 = sadd.s32 4294967294, %s1031_s23   ;;  %s1031_s23 = sphi %s1080_s23, %s28_s23   ;;  %s1027_s22 = sphi %s1078_s22, %s1365_s22   ;;  %s1023_s21 = sphi %s1076_s21, %s1364_s21   ;;  %s1019_s20 = sphi %s1074_s20, %s1363_s20   ;;  %s1015_s19 = sphi %s1072_s19, %s1362_s19   ;;  %s1011_s18 = sphi %s1070_s18, %s1361_s18  }
   0xb   : > { %s40_s26 = sadd.s32 1, %s1027_s22  ;;  %s75_s27 = sadd.s32 1, %s1019_s20 }
   0xc   : > { %p42_p0 = scmp.ge.s32.totalorder %s40_s26, 2  ;;  %p82_p1 = scmp.ne.s32.totalorder %s1019_s20, %s1015_s19 }
   0xd   : > { %p83_p2 = scmp.eq.s32.totalorder %s1031_s23, 0  ;;  %p88_p3 = scmp.ne.s32.totalorder %s1015_s19, %s1011_s18 }
   0xe   : > { %s1367_s26 = smov (%p42_p0, %s40_s26), 0  ;;  %p89_p5 = scmp.eq.s32.totalorder %s735_s24, 0 }
   0xf   : > { %p1111_p4 = por %p83_p2, %p82_p1  ;;  %s72_s29 = ssub.s32 %s1027_s22, %s1367_s26 }
  0x10   : > { %p168_p6 = scmp.eq.s32.totalorder %s735_s24, 1  ;;  %p73_p7 = scmp.eq.s32.totalorder %s72_s29, 0 }
  0x11   : > { %p1117_p8 = por %p89_p5, %p88_p3  ;;  %p174_p10 = scmp.eq.s32.totalorder %s736_s25, 1 }
  0x12   : > { %p1121_p9 = por %p168_p6, %p82_p1  ;;  %p795_p13 = scmp.lt.s32.totalorder %s1031_s23, 2 }
  0x13   : > { %s1349_s30 = scalar_select %p1117_p8, 1, 0 }
  0x14   : > { %s1350_s6 = scalar_select %p1121_p9, 1, 0 }
  0x15   : > { %s1126_s7 = scalar_select %p73_p7, %s1019_s20, %s75_s27  }
  0x16   : > { %p1128_p11 = por %p174_p10, %p88_p3  ;;  %s1135_s9 = sand.u32 1, %s1019_s20  }
  0x17   : > { %s739_s10 = sshll.u32 %s1135_s9, 3  ;;  %s740_s11 = sshll.u32 %s1027_s22, 7 }
  0x18   : > { %s1351_s8 = scalar_select %p1128_p11, 1, 0 }
  0x19   : > { %s1144_s14 = scalar_lea.hbm %s1341_s1, %s740_s11  ;;  %s236_s15 = scalar_lea.vmem [#allocation2], %s739_s10 }
  0x1a   : > { %s243_s16 = sshll.u32 %s236_s15, 4  ;;  %p1152_p0 = pnand %p795_p13, %p1111_p4  ;;  %s1148_s16 = int_to_ptr.vmem [resolvable:$true] %s243_s16 }
  0x1b   : > { %s233_s24 = scalar_lea.sflag [#allocation3], %s1135_s9  ;;  %s853_s25 = scalar_lea.hbm %s1144_s14, 128 }
  0x1c   : > { %p854_p3 = scmp.ne.s32.totalorder %s1144_s14, %s853_s25  ;;  %p855_p5 = pneg %p1152_p0 }
  0x1d   : > { %s858_s28 = scalar_lea.hbm %s1341_s1, 256  ;;  %p859_p4 = scmp.lt.u32.totalorder %s1144_s14, %s1341_s1 }
  0x1e   : > { %p856_p6 = pnand %p855_p5, %p854_p3  ;;  %p860_p10 = scmp.lt.u32.totalorder %s858_s28, %s853_s25 }
  0x1f   : > { %p862_p12 = scmp.lt.u32.totalorder %s853_s25, %s1144_s14 }
  0x20   : > { %p857_p7 = pneg %p856_p6  ;;  %p861_p13 = por %p860_p10, %p859_p4 }
  0x22   : > { %p863_p1 = por %p862_p12, %p861_p13 }
  0x24   : > { %p864_p2 = pnand %p863_p1, %p857_p7 }
  0x26   : > { %867 = shalt.err (!%p864_p2)
}
  0x27   : > { %s868_s15 = scalar_lea.vmem %s1148_s16, 128  ;;  %s1033_s27 = smov [#allocation2]  }
  0x28   : > { %p869_p3 = scmp.ne.s32.totalorder %s1148_s16, %s868_s15  ;;  %s873_s29 = sshll.u32 %s1033_s27, 4  ;;  %s874_s29 = int_to_ptr.vmem [resolvable:$false] %s873_s29 }
  0x29   : > { %s875_s12 = scalar_lea.vmem %s874_s29, 256  ;;  %p876_p9 = scmp.lt.s32.totalorder %s1148_s16, %s874_s29 }
  0x2a   : > { %p871_p6 = pnand %p869_p3, %p855_p5  ;;  %p877_p4 = scmp.lt.s32.totalorder %s875_s12, %s868_s15 }
  0x2c   : > { %p872_p11 = pneg %p871_p6  ;;  %p878_p10 = por %p877_p4, %p876_p9 }
  0x2e   : > { %p879_p12 = pnand %p878_p10, %p872_p11 }
  0x30   : > { %882 = shalt.err (!%p879_p12)
}
  0x31   : > { %784 = dma.hbm_to_vmem [thread:$0]  (!%p1152_p0), %s1144_s14, 128, %s1148_s16, %s233_s24  }
  0x32   : > { %p1353_p1 = scmp.lt.s32.totalorder %s1031_s23, 3  ;;  %p1354_p2 = scmp.ge.s32.totalorder %s1031_s23, 1 }
  0x33   : > { %s1197_s15 = scalar_lea.hbm %s1342_s2, %s740_s11  ;;  %s254_s27 = scalar_lea.vmem [#allocation5], %s739_s10 }
  0x34   : > { %p1188_p7 = pnand %p1354_p2, %p1353_p1  ;;  %s261_s29 = sshll.u32 %s254_s27, 4  ;;  %s262_s29 = int_to_ptr.vmem [resolvable:$true] %s261_s29 }
  0x35   : > { %s251_s14 = scalar_lea.sflag [#allocation6], %s1135_s9  ;;  %s883_s16 = scalar_lea.hbm %s1197_s15, 128 }
  0x36   : > { %s1355_s25 = scalar_select %p1188_p7, 1, 0 }
  0x37   : > { %p884_p9 = scmp.ne.s32.totalorder %s1197_s15, %s883_s16  ;;  %s888_s11 = scalar_lea.hbm %s1342_s2, 256 }
  0x38   : > { %p889_p3 = scmp.lt.u32.totalorder %s1197_s15, %s1342_s2  ;;  %p890_p6 = scmp.lt.u32.totalorder %s888_s11, %s883_s16 }
  0x39   : > { %p886_p11 = pnand %p884_p9, %p855_p5  ;;  %p892_p10 = scmp.lt.u32.totalorder %s883_s16, %s1197_s15 }
  0x3a   : > { %p891_p4 = por %p890_p6, %p889_p3 }
  0x3b   : > { %p887_p13 = pneg %p886_p11 }
  0x3c   : > { %p893_p12 = por %p892_p10, %p891_p4 }
  0x3e   : > { %p894_p1 = pnand %p893_p12, %p887_p13 }
  0x40   : > { %897 = shalt.err (!%p894_p1)
}
  0x41   : > { %s898_s9 = scalar_lea.vmem %s262_s29, 128  ;;  %s1034_s10 = smov [#allocation5]  }
  0x42   : > { %p899_p2 = scmp.ne.s32.totalorder %s262_s29, %s898_s9  ;;  %s903_s27 = sshll.u32 %s1034_s10, 4  ;;  %s904_s27 = int_to_ptr.vmem [resolvable:$false] %s903_s27 }
  0x43   : > { %s905_s24 = scalar_lea.vmem %s904_s27, 256  ;;  %p906_p8 = scmp.lt.s32.totalorder %s262_s29, %s904_s27 }
  0x44   : > { %p901_p9 = pnand %p899_p2, %p855_p5  ;;  %p907_p7 = scmp.lt.s32.totalorder %s905_s24, %s898_s9 }
  0x46   : > { %p902_p11 = pneg %p901_p9  ;;  %p908_p3 = por %p907_p7, %p906_p8 }
  0x48   : > { %p909_p6 = pnand %p908_p3, %p902_p11 }
  0x4a   : > { %912 = shalt.err (!%p909_p6)
}
  0x4b   : > { %787 = dma.hbm_to_vmem [thread:$0]  (!%p1152_p0), %s1197_s15, 128, %s262_s29, %s251_s14  }
  0x4c   : > { %p1356_p13 = scmp.ne.s32.totalorder %s1355_s25, 0 }
  0x4d   : > { %s1224_s16 = sand.u32 (!%p1356_p13), 1, %s1015_s19   ;;  %p1357_p8 = scmp.ne.s32.totalorder (!%p1356_p13), %s1349_s30, 0 }
  0x4e   : > { %280 = sbr.rel (%p1356_p13) target bundleno = 850 (0x352), region = 36  ;;  %s1227_s12 = sshll.u32 (!%p1356_p13), %s1224_s16, 3 }
  0x4f   : > { %s283_s11 = scalar_lea.sflag (!%p1356_p13), [#allocation3], %s1224_s16  ;;  %s286_s28 = scalar_lea.vmem (!%p1356_p13), [#allocation2], %s1227_s12 }
  0x55   : > { %994 = dma.done.wait (%p1357_p8), %s283_s11, 128  }
  0x56   : > { %996 = vsyncadd (%p1357_p8), %s283_s11, 4294967168  ;;  %s292_s17 = scalar_lea.sflag [#allocation6], %s1224_s16  ;;  %s295_s25 = scalar_lea.vmem [#allocation5], %s1227_s12 }
  0x57   : > { %998 = dma.done.wait (%p1357_p8), %s292_s17, 128  }
  0x58   : > { %1000 = vsyncadd (%p1357_p8), %s292_s17, 4294967168  ;;  %p346_p0 = scmp.lt.s32.totalorder %s1023_s21, 1  ;;  %v1035_v0 = vmov 0.0   ;;  %vm1036_vm0 = vmmov 0   ;;  %v1037_v1 = vmov 0   ;;  %vm363_vm1 = vcmask 261120  }
  0x59   : > { %763 = vmatprep.subr.mxu0 %v1035_v0  ;;  %765 = vmatprep.mubr.msk.f32.mxu0 %vm1036_vm0, %v1035_v0  ;;  %v362_v2 = vld [vmem:[%s286_s28] sm:$0xff]  ;;  %v440_v6 = vlaneseq  ;;  %vm448_vm3 = vcmask 64512   ;;  %v461_v18 = vld [vmem:[%s295_s25] sm:$0xff]  ;;  %s345_s24 = scalar_lea.vmem [#allocation8], %s1227_s12  ;;  %s755_s11 = sshll.u32 %s1023_s21, 7 }
  0x5a   : > { %s347_s15 = scalar_select %p346_p0, %s1023_s21, 1  ;;  %848 = vset.pattern.permute.xlu0 %v1037_v1  ;;  %768 = vmatprep.subr.mxu1 %v1035_v0 }
  0x5b   : > { %770 = vmatprep.mubr.msk.f32.mxu1 %vm1036_vm0, %v1035_v0  ;;  %764 = vmatpush3.xpose.msk.msra.mxu0 %vm363_vm1, %v362_v2  ;;  %v441_v7 = vand.u32 127, %v440_v6  ;;  %s542_s25 = scalar_lea.sflag [#allocation9], %s1224_s16  ;;  %p1358_p7 = scmp.ne.s32.totalorder %s1350_s6, 0 }
  0x5c   : > { %s748_s29 = sshll.u32 %s347_s15, 3  ;;  %769 = vmatpush3.msra.mxu1 %v461_v18  ;;  %s1264_s15 = scalar_lea.hbm %s1345_s5, %s755_s11 }
  0x5d   : > { %s352_s9 = scalar_lea.vmem %s1340_s0, %s748_s29  ;;  %s359_s27 = scalar_lea.vmem %s1343_s3, %s748_s29 }
  0x5e   : > { %v360_v3 = vld [vmem:[%s352_s9] sm:$0xff]  ;;  %s570_s29 = sshll.u32 %s345_s24, 4  ;;  %s1038_s13 = smov [#allocation8]   ;;  %s571_s29 = int_to_ptr.vmem [resolvable:$true] %s570_s29 }
  0x5f   : > { %v442_v4 = vld [vmem:[%s359_s27] sm:$0xff]  ;;  %v361_v5 = vmul.f32 0.17677669, %v360_v3  ;;  %s913_s14 = scalar_lea.vmem %s571_s29, 128  ;;  %s917_s9 = sshll.u32 %s1038_s13, 4  ;;  %s918_s9 = int_to_ptr.vmem [resolvable:$false] %s917_s9 }
  0x60   : > { %444 = vperm.xlu0 %848, %v442_v4   ;;  %p914_p5 = scmp.ne.s32.totalorder %s571_s29, %s913_s14  ;;  %s919_s30 = scalar_lea.vmem %s918_s9, 256 }
  0x61   : > { %766 = vmatmul.mubr.msk.f32.vlgmr.msra.gmra.mrb[0].mxu0 %vm363_vm1, %v361_v5  ;;  %p920_p12 = scmp.lt.s32.totalorder %s571_s29, %s918_s9  ;;  %p921_p1 = scmp.lt.s32.totalorder %s919_s30, %s913_s14 }
  0x62   : > { %p915_p4 = pnand %p914_p5, %p1358_p7 }
  0x63   : > { %p922_p2 = por %p921_p1, %p920_p12 }
  0x64   : > { %p916_p10 = pneg %p915_p4 }
  0x66   : > { %p923_p9 = pnand %p922_p2, %p916_p10 }
  0xdf   : > { %v445_v8 = vpop.permute.xlu0 %444 }
  0xe0   : > { %vm446_vm2 = vcmp.lt.s32.totalorder %v441_v7, %v445_v8 }
 0x134   : > { %v436_v9 = vpop.f32.mrb[0].mxu0 }
 0x135   : > { %v447_v10 = vsel %vm446_vm2, %v436_v9, -1000000.0  ;;  %v767_v11 = vpop.f32.mrb[1].mxu0 }
 0x136   : > { %v449_v12 = vsel %vm448_vm3, %v447_v10, -inf }
 0x137   : > { %450 = vmax.xlane.f32.xlu0 %v449_v12 }
 0x1c4   : > { %v451_v13 = vpop.xlane.xlu0 %450 }
 0x1c5   : > { %v452_v14 = vsub.f32 %v447_v10, %v451_v13 }
 0x1c7   : > { %v453_v15 = vmul.f32 1.442695, %v452_v14 }
 0x1c9   : > { %849 = vpow2.f32 %v453_v15 }
 0x1d3   : > { %v850_v16 = vpop.eup %849 }
 0x1d4   : > { %v455_v17 = vsel %vm448_vm3, %v850_v16, 0.0 }
 0x1d5   : > { %456 = vadd.xlane.f32.xlu1 %v455_v17 }
 0x262   : > { %v457_v19 = vpop.xlane.xlu1 %456 }
 0x263   : > { %851 = vrcp.f32 %v457_v19 }
 0x26d   : > { %v852_v20 = vpop.eup %851 }
 0x26e   : > { %v459_v21 = vmul.f32 %v852_v20, %v850_v16 }
 0x270   : > { %771 = vmatmul.mubr.msk.f32.vlgmr.msra.gmra.mrb[0].mxu1 %vm448_vm3, %v459_v21  ;;  %460 = vst.msk [vmem:[%s345_s24] sm:$0xff] %vm448_vm3, %v459_v21 }
 0x271   : > { %926 = shalt.err (!%p923_p9)
}
 0x272   : > { %s927_s10 = scalar_lea.hbm %s1264_s15, 128  ;;  %s931_s28 = scalar_lea.hbm %s1345_s5, 256 }
 0x273   : > { %p928_p11 = scmp.ne.s32.totalorder %s1264_s15, %s927_s10  ;;  %p932_p13 = scmp.lt.u32.totalorder %s1264_s15, %s1345_s5 }
 0x274   : > { %p933_p8 = scmp.lt.u32.totalorder %s931_s28, %s927_s10  ;;  %p935_p5 = scmp.lt.u32.totalorder %s927_s10, %s1264_s15 }
 0x275   : > { %p929_p3 = pnand %p928_p11, %p1358_p7 }
 0x276   : > { %p934_p0 = por %p933_p8, %p932_p13 }
 0x277   : > { %p930_p6 = pneg %p929_p3 }
 0x278   : > { %p936_p4 = por %p935_p5, %p934_p0 }
 0x27a   : > { %p937_p10 = pnand %p936_p4, %p930_p6 }
 0x27c   : > { %940 = shalt.err (!%p937_p10)
}
 0x27d   : > { %778 = dma.vmem_to_hbm [thread:$0]  (%p1358_p7), %s571_s29, 128, %s1264_s15, %s542_s25  }
 0x27e   : > { %s338_s14 = scalar_lea.vmem [#allocation7], %s1227_s12  ;;  %s1290_s24 = scalar_lea.hbm %s1344_s4, %s755_s11 }
 0x27f   : > { %s556_s9 = sshll.u32 %s338_s14, 4  ;;  %s537_s10 = scalar_lea.sflag [#allocation4], %s1224_s16  ;;  %s1292_s9 = int_to_ptr.vmem [resolvable:$true] %s556_s9 }
 0x280   : > { %s941_s28 = scalar_lea.vmem %s1292_s9, 128  ;;  %s1039_s21 = smov [#allocation7]  }
 0x281   : > { %p942_p12 = scmp.ne.s32.totalorder %s1292_s9, %s941_s28  ;;  %s945_s12 = sshll.u32 %s1039_s21, 4  ;;  %s946_s12 = int_to_ptr.vmem [resolvable:$false] %s945_s12 }
 0x282   : > { %s947_s11 = scalar_lea.vmem %s946_s12, 256  ;;  %p948_p9 = scmp.lt.s32.totalorder %s1292_s9, %s946_s12 }
 0x283   : > { %p943_p1 = pnand %p942_p12, %p1358_p7  ;;  %p949_p11 = scmp.lt.s32.totalorder %s947_s11, %s941_s28 }
 0x285   : > { %p944_p2 = pneg %p943_p1  ;;  %p950_p3 = por %p949_p11, %p948_p9 }
 0x287   : > { %p951_p6 = pnand %p950_p3, %p944_p2 }
 0x343   : > { %v531_v22 = vpop.f32.mrb[0].mxu1 }
 0x344   : > { %535 = vst.msk [vmem:[%s338_s14] sm:$0xff] %vm363_vm1, %v531_v22  ;;  %v772_v23 = vpop.f32.mrb[1].mxu1 }
 0x345   : > { %954 = shalt.err (!%p951_p6)
}
 0x346   : > { %s955_s16 = scalar_lea.hbm %s1290_s24, 128  ;;  %s959_s25 = scalar_lea.hbm %s1344_s4, 256 }
 0x347   : > { %p956_p13 = scmp.ne.s32.totalorder %s1290_s24, %s955_s16  ;;  %p960_p5 = scmp.lt.u32.totalorder %s1290_s24, %s1344_s4 }
 0x348   : > { %p961_p4 = scmp.lt.u32.totalorder %s959_s25, %s955_s16  ;;  %p963_p12 = scmp.lt.u32.totalorder %s955_s16, %s1290_s24 }
 0x349   : > { %p957_p8 = pnand %p956_p13, %p1358_p7 }
 0x34a   : > { %p962_p10 = por %p961_p4, %p960_p5 }
 0x34b   : > { %p958_p0 = pneg %p957_p8 }
 0x34c   : > { %p964_p1 = por %p963_p12, %p962_p10 }
 0x34e   : > { %p965_p2 = pnand %p964_p1, %p958_p0 }
 0x350   : > { %968 = shalt.err (!%p965_p2)
}
 0x351   : > { %777 = dma.vmem_to_hbm [thread:$0]  (%p1358_p7), %s1292_s9, 128, %s1290_s24, %s537_s10  }
 0x352 PF: > { %s582_s14 = sand.u32 1, %s1011_s18   ;;  %p1359_p9 = scmp.ne.s32.totalorder %s1351_s8, 0 }
 0x353   : > { %p1360_p11 = scmp.ge.s32.totalorder %s1031_s23, 2  ;;  %s583_s30 = scalar_lea.sflag [#allocation4], %s582_s14 }
 0x355   : > { %p789_p3 = pnand %p1360_p11, %p1359_p9 }
 0x357   : > { %1002 = dma.done.wait (!%p789_p3), %s583_s30, 128  }
 0x358   : > { %1004 = vsyncadd (!%p789_p3), %s583_s30, 4294967168  ;;  %s592_s27 = scalar_lea.sflag [#allocation9], %s582_s14 }
 0x359   : > { %1006 = dma.done.wait (!%p789_p3), %s592_s27, 128  }
 0x35a   : > { %1008 = vsyncadd (!%p789_p3), %s592_s27, 4294967168  ;;  %s28_s23 = sadd.s32 1, %s1031_s23   ;;  %s1361_s18 = smov %s1015_s19 }
 0x35b   : > { %p25_p6 = scmp.ge.s32.totalorder %s28_s23, 4   ;;  %s1362_s19 = smov %s1019_s20 }
 0x35c   : > { %s1363_s20 = smov %s1126_s7  ;;  %s1364_s21 = smov %s1027_s22 }
 0x35d   : > { %s1365_s22 = smov %s1367_s26  ;;  %27 = sbr.rel (!%p25_p6) target bundleno = 10 (0xa), region = 117 }
 0x364   :  { %597 = vsyncpa [#allocation3], 1 }
 0x365   :  { %599 = vsyncpa [#allocation3 + $0x1], 1 }
 0x366   :  { %600 = vsyncpa [#allocation6], 1 }
 0x367   :  { %602 = vsyncpa [#allocation6 + $0x1], 1 }
 0x368   :  { %603 = vsyncpa [#allocation4], 1 }
 0x369   :  { %605 = vsyncpa [#allocation4 + $0x1], 1 }
 0x36a   :  { %606 = vsyncpa [#allocation9], 1 }
 0x36b   :  { %608 = vsyncpa [#allocation9 + $0x1], 1 }

</bundles_post_ra>
